<compile_context>
chip_gen: v7x
topology: tpu7x:2x2x1
jax: 0.10.0
libtpu: 0.0.40
codegen_flags: <defaults>
</compile_context>

<pallas_src>
import functools

import jax
import jax.numpy as jnp
import numpy as np
from jax.experimental import pallas as pl
from jax.experimental.pallas import tpu as pltpu


def _round_up(x, m):
    return ((x + m - 1) // m) * m


def _choose_tiles(n):
    """Pick (n_pad, tm, tk) with tm | tk and tk | n_pad, all multiples of 128.

    tk is grown preferentially: it sets the contiguous-run length of every row
    of the streamed G tile (tk*2 bytes), while tm only sizes the k-partial
    accumulator and the commit write.  Small graphs use one resident tile so G
    is DMAed exactly once across all layers (constant block index).
    """
    n128 = _round_up(max(int(n), 1), 128)
    if n128 <= 2048:
        return n128, n128, n128
    if n128 <= 8192:
        tk = 1024          # keeps zero-padding (< tk rows) modest at mid sizes
    else:
        tk = 2048          # 4 KB contiguous runs per G-tile row
    tm = min(1024, tk)     # 4 MB bf16 G tile at tk=2048 -> ~10% step overhead
    n_pad = _round_up(n, tk)
    return n_pad, tm, tk


def _vmem_limit_bytes(n_pad, d_pad, tm, tk):
    """Scoped-VMEM budget sized to the actual residency (defaults are 16/32 MiB)."""
    resident = (2 * n_pad * d_pad * 2      # cur ping-pong (bf16)
                + n_pad * d_pad * 4        # acc layer sum (f32)
                + tm * d_pad * 4)          # k-partial (f32)
    tiles = (2 * tm * tk * 2               # double-buffered bf16 G stream
             + 2 * tk * d_pad * 4          # e0 blocks
             + 2 * tm * d_pad * 4)         # out blocks
    need = int((resident + tiles) * 1.25) + (4 << 20)
    try:
        cap = int(pltpu.get_tpu_info().vmem_capacity_bytes)
    except Exception:
        cap = 64 << 20                     # smallest-VMEM generation (v7x)
    return max(48 << 20, min(need, cap - (2 << 20)))


# ----------------------------------------------------------------------------
# Kernel: LightGCN propagation  (G @ E repeated over layers, mean over layers)
# grid = (n_layers, N_pad // tm, N_pad // tk), layer outermost, k innermost.
# ----------------------------------------------------------------------------
def _propagate_kernel(g_ref, e0_ref, out_ref, cur_ref, acc_ref, part_ref,
                      *, n_layers, n_pad):
    l = pl.program_id(0)        # layer (sequential recurrence)
    m = pl.program_id(1)        # output row tile
    k = pl.program_id(2)        # contraction tile
    n_k = pl.num_programs(2)

    tm = part_ref.shape[0]
    tk = g_ref.shape[1]
    row_m = pl.multiple_of(m * tm, tm)
    row_k = pl.multiple_of(k * tk, tk)

    src = l % 2                 # ping-pong half holding e^{(l)}
    dst = 1 - src

    # --- one-time seed (layer 0, first row tile): the k loop covers every ---
    # --- padded node row, so cur/acc are fully initialised before any read ---
    @pl.when(jnp.logical_and(l == 0, m == 0))
    def _():
        e0 = e0_ref[...]                                    # (tk, D_pad) f32
        cur_ref[pl.ds(row_k, tk), :] = e0.astype(cur_ref.dtype)
        acc_ref[pl.ds(row_k, tk), :] = e0

    # --- partial MXU product: G[m, k] @ e^{(l)}[k]  (bf16 x bf16 -> f32) ---
    src_off = pl.multiple_of(src * n_pad + row_k, tk)
    partial = jnp.dot(g_ref[...], cur_ref[pl.ds(src_off, tk), :],
                      preferred_element_type=jnp.float32)

    # First k tile assigns, later tiles accumulate (no zero-fill pass).
    @pl.when(k == 0)
    def _():
        part_ref[...] = partial

    @pl.when(k > 0)
    def _():
        part_ref[...] += partial

    # --- last k tile: commit e^{(l+1)}[m] and fold it into the layer sum ---
    @pl.when(k == n_k - 1)
    def _():
        new_emb = part_ref[...]                             # (tm, D_pad) f32
        dst_off = pl.multiple_of(dst * n_pad + row_m, tm)
        cur_ref[pl.ds(dst_off, tm), :] = new_emb.astype(cur_ref.dtype)
        acc_ref[pl.ds(row_m, tm), :] += new_emb

    # --- final layer: emit the mean over the (n_layers + 1) embeddings ---
    @pl.when(jnp.logical_and(k == n_k - 1, l == n_layers - 1))
    def _():
        out_ref[...] = acc_ref[pl.ds(row_m, tm), :] * (1.0 / (n_layers + 1))


# ----------------------------------------------------------------------------
# One-time graph preparation (outside the per-forward path)
# ----------------------------------------------------------------------------
def prepare_graph(graph):
    """Quantize + pad the normalized adjacency ONCE and reuse across forwards.

    Cast to bf16 *before* padding so no f32 (n_pad, n_pad) intermediate is
    materialized; rebuilding it per call costs ~1-1.5 propagation layers of
    extra HBM traffic.
    """
    N = graph.shape[0]
    assert graph.shape == (N, N)
    n_pad, tm, tk = _choose_tiles(N)
    # TODO(synk): per-row-scale int8 (v5e/v6e) / fp8 (v7x) G halves the dominant
    #             HBM stream again; needs accuracy validation on real graphs.
    # TODO(synk): real LightGCN graphs are ~0.1-1% dense; replace the dense G
    #             stream with a scalar-prefetch CSR SpMM for production sizes.
    g = jnp.asarray(graph, jnp.bfloat16)
    g = jnp.pad(g, ((0, n_pad - N), (0, n_pad - N)))
    return g, (n_pad, tm, tk)


def lightgcn_propagate(g_padded, tiles, all_emb, n_layers):
    N, D = all_emb.shape
    n_pad, tm, tk = tiles
    assert g_padded.shape == (n_pad, n_pad)
    assert n_layers >= 1 and N <= n_pad

    d_pad = _round_up(D, 128)          # lane-dense MXU passes and stores
    e0 = jnp.zeros((n_pad, d_pad), jnp.float32).at[:N, :D].set(all_emb)

    def g_map(l, m, k):
        return (m, k)

    def e0_map(l, m, k):
        # e0 is only consumed at (l==0, m==0); pin the block index afterwards
        # so the pipeline stops re-fetching it.
        first = jnp.logical_and(l == 0, m == 0)
        return (jnp.where(first, k, 0), 0)

    def out_map(l, m, k):
        # Only the final layer writes; pinning earlier layers to block 0 keeps
        # HBM write-backs at the minimum (one per row tile).
        return (jnp.where(l == n_layers - 1, m, 0), 0)

    kernel = functools.partial(_propagate_kernel, n_layers=n_layers, n_pad=n_pad)

    out = pl.pallas_call(
        kernel,
        out_shape=jax.ShapeDtypeStruct((n_pad, d_pad), jnp.float32),
        grid_spec=pltpu.PrefetchScalarGridSpec(
            num_scalar_prefetch=0,
            grid=(n_layers, n_pad // tm, n_pad // tk),
            in_specs=[
                # TODO(synk): try pipeline_mode=pl.Buffered(3) on the G stream
                #             once the target jax version is pinned (few-% DMA
                #             smoothing at the cost of one extra tm*tk*2 buffer).
                pl.BlockSpec((tm, tk), g_map),       # streamed bf16 graph tile
                pl.BlockSpec((tk, d_pad), e0_map),   # initial embeddings
            ],
            out_specs=pl.BlockSpec((tm, d_pad), out_map),
            scratch_shapes=[
                pltpu.VMEM((2 * n_pad, d_pad), jnp.bfloat16),  # cur ping-pong
                pltpu.VMEM((n_pad, d_pad), jnp.float32),       # layer sum
                pltpu.VMEM((tm, d_pad), jnp.float32),          # k-partial
            ],
        ),
        compiler_params=pltpu.CompilerParams(
            # m/k must stay "arbitrary": cur/acc scratch is shared across row
            # tiles, so sharding m across v7x's two TCs would break the layer
            # recurrence.  TODO(synk): v7x dual-core via pl.core_map +
            # pltpu.VMEM_SHARED source half + pltpu.core_barrier per layer.
            dimension_semantics=("arbitrary", "arbitrary", "arbitrary"),
            vmem_limit_bytes=_vmem_limit_bytes(n_pad, d_pad, tm, tk)),
    )(g_padded, e0)
    return out[:N, :D]


# ----------------------------------------------------------------------------
# Full forward (= LightGCN.forward(users, items)); gather + scoring in JAX.
# ----------------------------------------------------------------------------
def lightgcn_forward(g_padded, tiles, user_emb, item_emb, users, items, n_layers):
    num_users = user_emb.shape[0]
    all_emb = jnp.concatenate([user_emb, item_emb], axis=0)
    light_out = lightgcn_propagate(g_padded, tiles, all_emb, n_layers)
    all_users = light_out[:num_users]
    all_items = light_out[num_users:]
    users_emb = all_users[users]
    items_emb = all_items[items]
    # Tiny (B,) scoring stays in plain JAX: at B=8 a dedicated pallas_call is
    # pure dispatch overhead and a (B, 1) output forces masked 1-lane stores.
    # TODO(synk): for large batches, fuse this gather + row dot into a
    #             scalar-prefetch Pallas kernel with a lane-dense output.
    return jnp.sum(users_emb * items_emb, axis=1)


# ----------------------------------------------------------------------------
# Deterministic synthetic setup + references
# ----------------------------------------------------------------------------
def build_normalized_graph(key, num_users, num_items):
    """Dense analogue of dataset.getSparseGraph(): D^{-1/2} A D^{-1/2}."""
    R = jax.random.bernoulli(key, p=0.2,
                             shape=(num_users, num_items)).astype(jnp.float32)
    N = num_users + num_items
    A = jnp.zeros((N, N), jnp.float32)
    A = A.at[:num_users, num_users:].set(R)
    A = A.at[num_users:, :num_users].set(R.T)
    deg = A.sum(axis=1)
    d_inv_sqrt = jnp.where(deg > 0, 1.0 / jnp.sqrt(deg), 0.0)
    return d_inv_sqrt[:, None] * A * d_inv_sqrt[None, :]


def _reference_scores(graph, all_emb, users, items, num_users, n_layers,
                      quantized):
    if quantized:
        # Kernel's quantization points: bf16 graph, bf16 per-layer operand,
        # f32 accumulation.
        g = graph.astype(jnp.bfloat16)
        cur = all_emb.astype(jnp.bfloat16)
        acc = all_emb
        for _ in range(n_layers):
            new = jnp.dot(g, cur, preferred_element_type=jnp.float32)
            acc = acc + new
            cur = new.astype(jnp.bfloat16)
        light = acc / (n_layers + 1)
    else:
        # Exact module semantics in f32.
        embs = [all_emb]
        cur = all_emb
        for _ in range(n_layers):
            cur = graph @ cur
            embs.append(cur)
        light = jnp.mean(jnp.stack(embs, axis=1), axis=1)
    return jnp.sum(light[:num_users][users] * light[num_users:][items], axis=1)


if __name__ == "__main__":
    num_users, num_items = 16, 48          # n_users, m_items
    latent_dim = 32                        # config['latent_dim_rec']
    n_layers = 3                           # config['lightGCN_n_layers']
    batch = 8

    key = jax.random.PRNGKey(0)
    k_u, k_i, k_g, k_uid, k_iid = jax.random.split(key, 5)

    # nn.init.normal_(weight, std=0.1)
    user_emb = 0.1 * jax.random.normal(k_u, (num_users, latent_dim), jnp.float32)
    item_emb = 0.1 * jax.random.normal(k_i, (num_items, latent_dim), jnp.float32)
    graph = build_normalized_graph(k_g, num_users, num_items)

    users = jax.random.randint(k_uid, (batch,), 0, num_users)
    items = jax.random.randint(k_iid, (batch,), 0, num_items)

    # Prepare (pad + bf16-quantize) the graph ONCE, outside the forward path.
    g_prep, tiles = prepare_graph(graph)

    gamma = lightgcn_forward(g_prep, tiles, user_emb, item_emb, users, items,
                             n_layers)
    gamma = jax.block_until_ready(gamma)
    assert gamma.shape == (batch,)

    all_emb = jnp.concatenate([user_emb, item_emb], axis=0)

    # Reference 1: exact module semantics in f32 (loose tolerance since the
    # kernel quantizes the graph / per-layer operand to bf16, ~1e-3 relative).
    ref_f32 = _reference_scores(graph, all_emb, users, items, num_users,
                                n_layers, quantized=False)
    np.testing.assert_allclose(np.asarray(gamma), np.asarray(ref_f32),
                               rtol=2e-2, atol=3e-3)

    # Reference 2: same math with the kernel's bf16 quantization points -> tight.
    ref_q = _reference_scores(graph, all_emb, users, items, num_users,
                              n_layers, quantized=True)
    np.testing.assert_allclose(np.asarray(gamma), np.asarray(ref_q),
                               rtol=5e-3, atol=1e-5)

    # Regression: n_layers=1 exercises the pinned out_map writeback path
    # (output block is written on the very first — and only — layer).
    gamma_1 = jax.block_until_ready(
        lightgcn_forward(g_prep, tiles, user_emb, item_emb, users, items, 1))
    ref_1 = _reference_scores(graph, all_emb, users, items, num_users, 1,
                              quantized=True)
    np.testing.assert_allclose(np.asarray(gamma_1), np.asarray(ref_1),
                               rtol=5e-3, atol=1e-5)

    print("KERNEL_OK")
</pallas_src>

<mosaic_0001>
module attributes {stable_mosaic.version = 11 : i64} {
  func.func @_propagate_kernel(%arg0: i32, %arg1: i32, %arg2: i32, %arg3: memref<128x128xbf16, #tpu.memory_space<vmem>>, %arg4: memref<128x128xf32, #tpu.memory_space<vmem>>, %arg5: memref<128x128xf32, #tpu.memory_space<vmem>>, %arg6: memref<256x128xbf16, #tpu.memory_space<vmem>>, %arg7: memref<128x128xf32, #tpu.memory_space<vmem>>, %arg8: memref<128x128xf32, #tpu.memory_space<vmem>>) attributes {dimension_semantics = [#tpu.dimension_semantics<arbitrary>, #tpu.dimension_semantics<arbitrary>, #tpu.dimension_semantics<arbitrary>], iteration_bounds = array<i64: 3, 1, 1>, scalar_prefetch = 0 : i64, scratch_operands = 3 : i64, tpu.core_type = #tpu.core_type<tc>, window_params = [{transform_indices = @transform_0, window_bounds = array<i64: 128, 128>}, {transform_indices = @transform_1, window_bounds = array<i64: 128, 128>}, {transform_indices = @transform_2, window_bounds = array<i64: 128, 128>}]} {
    %c128_i32 = arith.constant 128 : i32
    %0 = arith.muli %arg1, %c128_i32 : i32
    %1 = tpu.assume_multiple %0, 128 : i32
    %c128_i32_0 = arith.constant 128 : i32
    %2 = arith.muli %arg2, %c128_i32_0 : i32
    %3 = tpu.assume_multiple %2, 128 : i32
    %c2_i32 = arith.constant 2 : i32
    %c0_i32 = arith.constant 0 : i32
    %4 = arith.cmpi eq, %c2_i32, %c0_i32 : i32
    %c1_i32 = arith.constant 1 : i32
    %5 = arith.select %4, %c1_i32, %c2_i32 : i32
    %6 = arith.remsi %arg0, %5 : i32
    %c0_i32_1 = arith.constant 0 : i32
    %7 = arith.cmpi ne, %6, %c0_i32_1 : i32
    %c0_i32_2 = arith.constant 0 : i32
    %8 = arith.cmpi slt, %6, %c0_i32_2 : i32
    %c0_i32_3 = arith.constant 0 : i32
    %9 = arith.cmpi slt, %5, %c0_i32_3 : i32
    %10 = arith.xori %8, %9 : i1
    %11 = arith.andi %10, %7 : i1
    %12 = arith.addi %6, %5 : i32
    %13 = arith.select %11, %12, %6 : i32
    %c1_i32_4 = arith.constant 1 : i32
    %14 = arith.subi %c1_i32_4, %13 : i32
    %c0_i32_5 = arith.constant 0 : i32
    %15 = arith.cmpi eq, %arg0, %c0_i32_5 : i32
    %c0_i32_6 = arith.constant 0 : i32
    %16 = arith.cmpi eq, %arg1, %c0_i32_6 : i32
    %17 = arith.andi %15, %16 : i1
    %18 = arith.extui %17 : i1 to i32
    %c0_i32_7 = arith.constant 0 : i32
    %19 = arith.cmpi ne, %18, %c0_i32_7 : i32
    scf.if %19 {
      %c0_20 = arith.constant 0 : index
      %c0_21 = arith.constant 0 : index
      %41 = vector.load %arg4[%c0_20, %c0_21] : memref<128x128xf32, #tpu.memory_space<vmem>>, vector<128x128xf32>
      %42 = arith.truncf %41 : vector<128x128xf32> to vector<128x128xbf16>
      %43 = arith.index_cast %3 : i32 to index
      %c0_22 = arith.constant 0 : index
      %44 = vector.load %arg6[%43, %c0_22] : memref<256x128xbf16, #tpu.memory_space<vmem>>, vector<128x128xbf16>
      tpu.vector_store %arg6[%43, %c0_22], %42 {strides = array<i32>} : memref<256x128xbf16, #tpu.memory_space<vmem>>, vector<128x128xbf16>,
      %45 = arith.index_cast %3 : i32 to index
      %c0_23 = arith.constant 0 : index
      %46 = vector.load %arg7[%45, %c0_23] : memref<128x128xf32, #tpu.memory_space<vmem>>, vector<128x128xf32>
      tpu.vector_store %arg7[%45, %c0_23], %41 {strides = array<i32>} : memref<128x128xf32, #tpu.memory_space<vmem>>, vector<128x128xf32>,
    } else {
    }
    %c128_i32_8 = arith.constant 128 : i32
    %20 = arith.muli %13, %c128_i32_8 : i32
    %21 = arith.addi %20, %3 : i32
    %22 = tpu.assume_multiple %21, 128 : i32
    %c0 = arith.constant 0 : index
    %c0_9 = arith.constant 0 : index
    %23 = vector.load %arg3[%c0, %c0_9] : memref<128x128xbf16, #tpu.memory_space<vmem>>, vector<128x128xbf16>
    %24 = arith.index_cast %22 : i32 to index
    %c0_10 = arith.constant 0 : index
    %25 = vector.load %arg6[%24, %c0_10] : memref<256x128xbf16, #tpu.memory_space<vmem>>, vector<128x128xbf16>
    %cst = arith.constant dense<0.000000e+00> : vector<128x128xf32>
    %26 = tpu.matmul %23, %25, %cst {dimension_numbers = #tpu.dot_dimension_numbers<[1], [0], [0], [1], [0, 0, 1, 1], [], []>} : vector<128x128xbf16>, vector<128x128xbf16>, vector<128x128xf32> -> vector<128x128xf32>
    %c0_i32_11 = arith.constant 0 : i32
    %27 = arith.cmpi eq, %arg2, %c0_i32_11 : i32
    %28 = arith.extui %27 : i1 to i32
    %c0_i32_12 = arith.constant 0 : i32
    %29 = arith.cmpi ne, %28, %c0_i32_12 : i32
    scf.if %29 {
      %c0_20 = arith.constant 0 : index
      %c0_21 = arith.constant 0 : index
      %41 = vector.load %arg8[%c0_20, %c0_21] : memref<128x128xf32, #tpu.memory_space<vmem>>, vector<128x128xf32>
      tpu.vector_store %arg8[%c0_20, %c0_21], %26 {strides = array<i32>} : memref<128x128xf32, #tpu.memory_space<vmem>>, vector<128x128xf32>,
    } else {
    }
    %c0_i32_13 = arith.constant 0 : i32
    %30 = arith.cmpi sgt, %arg2, %c0_i32_13 : i32
    %31 = arith.extui %30 : i1 to i32
    %c0_i32_14 = arith.constant 0 : i32
    %32 = arith.cmpi ne, %31, %c0_i32_14 : i32
    scf.if %32 {
      %c0_20 = arith.constant 0 : index
      %c0_21 = arith.constant 0 : index
      %41 = vector.load %arg8[%c0_20, %c0_21] : memref<128x128xf32, #tpu.memory_space<vmem>>, vector<128x128xf32>
      %42 = arith.addf %41, %26 : vector<128x128xf32>
      %c0_22 = arith.constant 0 : index
      %c0_23 = arith.constant 0 : index
      %43 = vector.load %arg8[%c0_22, %c0_23] : memref<128x128xf32, #tpu.memory_space<vmem>>, vector<128x128xf32>
      tpu.vector_store %arg8[%c0_22, %c0_23], %42 {strides = array<i32>} : memref<128x128xf32, #tpu.memory_space<vmem>>, vector<128x128xf32>,
    } else {
    }
    %c0_i32_15 = arith.constant 0 : i32
    %33 = arith.cmpi eq, %arg2, %c0_i32_15 : i32
    %34 = arith.extui %33 : i1 to i32
    %c0_i32_16 = arith.constant 0 : i32
    %35 = arith.cmpi ne, %34, %c0_i32_16 : i32
    scf.if %35 {
      %c0_20 = arith.constant 0 : index
      %c0_21 = arith.constant 0 : index
      %41 = vector.load %arg8[%c0_20, %c0_21] : memref<128x128xf32, #tpu.memory_space<vmem>>, vector<128x128xf32>
      %c128_i32_22 = arith.constant 128 : i32
      %42 = arith.muli %14, %c128_i32_22 : i32
      %43 = arith.addi %42, %1 : i32
      %44 = tpu.assume_multiple %43, 128 : i32
      %45 = arith.truncf %41 : vector<128x128xf32> to vector<128x128xbf16>
      %46 = arith.index_cast %44 : i32 to index
      %c0_23 = arith.constant 0 : index
      %47 = vector.load %arg6[%46, %c0_23] : memref<256x128xbf16, #tpu.memory_space<vmem>>, vector<128x128xbf16>
      tpu.vector_store %arg6[%46, %c0_23], %45 {strides = array<i32>} : memref<256x128xbf16, #tpu.memory_space<vmem>>, vector<128x128xbf16>,
      %48 = arith.index_cast %1 : i32 to index
      %c0_24 = arith.constant 0 : index
      %49 = vector.load %arg7[%48, %c0_24] : memref<128x128xf32, #tpu.memory_space<vmem>>, vector<128x128xf32>
      %50 = arith.addf %49, %41 : vector<128x128xf32>
      %51 = arith.index_cast %1 : i32 to index
      %c0_25 = arith.constant 0 : index
      %52 = vector.load %arg7[%51, %c0_25] : memref<128x128xf32, #tpu.memory_space<vmem>>, vector<128x128xf32>
      tpu.vector_store %arg7[%51, %c0_25], %50 {strides = array<i32>} : memref<128x128xf32, #tpu.memory_space<vmem>>, vector<128x128xf32>,
    } else {
    }
    %c0_i32_17 = arith.constant 0 : i32
    %36 = arith.cmpi eq, %arg2, %c0_i32_17 : i32
    %c2_i32_18 = arith.constant 2 : i32
    %37 = arith.cmpi eq, %arg0, %c2_i32_18 : i32
    %38 = arith.andi %36, %37 : i1
    %39 = arith.extui %38 : i1 to i32
    %c0_i32_19 = arith.constant 0 : i32
    %40 = arith.cmpi ne, %39, %c0_i32_19 : i32
    scf.if %40 {
      %41 = arith.index_cast %1 : i32 to index
      %c0_20 = arith.constant 0 : index
      %42 = vector.load %arg7[%41, %c0_20] : memref<128x128xf32, #tpu.memory_space<vmem>>, vector<128x128xf32>
      %cst_21 = arith.constant 2.500000e-01 : f32
      %43 = vector.broadcast %cst_21 : f32 to vector<128x128xf32>
      %44 = arith.mulf %42, %43 : vector<128x128xf32>
      %c0_22 = arith.constant 0 : index
      %c0_23 = arith.constant 0 : index
      %45 = vector.load %arg5[%c0_22, %c0_23] : memref<128x128xf32, #tpu.memory_space<vmem>>, vector<128x128xf32>
      tpu.vector_store %arg5[%c0_22, %c0_23], %44 {strides = array<i32>} : memref<128x128xf32, #tpu.memory_space<vmem>>, vector<128x128xf32>,
    } else {
    }
    return
  }
  func.func @transform_0(%arg0: i32, %arg1: i32, %arg2: i32) -> (i32, i32) {
    %c0_i32 = arith.constant 0 : i32
    return %arg1, %arg2 : i32, i32
  }
  func.func @transform_1(%arg0: i32, %arg1: i32, %arg2: i32) -> (i32, i32) {
    %c0_i32 = arith.constant 0 : i32
    %0 = arith.cmpi eq, %arg0, %c0_i32 : i32
    %c0_i32_0 = arith.constant 0 : i32
    %1 = arith.cmpi eq, %arg1, %c0_i32_0 : i32
    %2 = arith.andi %0, %1 : i1
    %c0_i32_1 = arith.constant 0 : i32
    %3 = arith.select %2, %arg2, %c0_i32_1 : i32
    %c0_i32_2 = arith.constant 0 : i32
    %c0_i32_3 = arith.constant 0 : i32
    return %3, %c0_i32_2 : i32, i32
  }
  func.func @transform_2(%arg0: i32, %arg1: i32, %arg2: i32) -> (i32, i32) {
    %c2_i32 = arith.constant 2 : i32
    %0 = arith.cmpi eq, %arg0, %c2_i32 : i32
    %c0_i32 = arith.constant 0 : i32
    %1 = arith.select %0, %arg1, %c0_i32 : i32
    %c0_i32_0 = arith.constant 0 : i32
    %c0_i32_1 = arith.constant 0 : i32
    return %1, %c0_i32_0 : i32, i32
  }
}

</mosaic_0001>

<bundles_post_ra>
// kernel: tpu_custom_call.1
= control target key start
LH: loop header
LB: loop body
LE: loop exit
PB: predicated region body
PF: predicated region fallthrough
CT: control target
= control target key end

     0   :  { %7 = vsyncpa [#allocation6], 0  ;;  %s1308_s0 = inlined_call_operand.hbm [shape: bf16[128,128], index: 0, kind: input, shape index: {}]   ;;  %s1309_s1 = inlined_call_operand.hbm [shape: f32[128,128], index: 1, kind: input, shape index: {}]   ;;  %s1310_s2 = inlined_call_operand.hbm [shape: f32[128,128], index: 2, kind: output, shape index: {}]  }
   0x1   :  { %8 = vsyncpa [#allocation9], 0 }
   0x2   :  { %10 = vsyncpa [#allocation9 + $0x1], 0 }
   0x3   :  { %11 = vsyncpa [#allocation7], 0 }
   0x4   :  { %13 = vsyncpa [#allocation7 + $0x1], 0  ;;  %s1147_s9 = smov 0   ;;  %s1149_s10 = smov 0  }
   0x5   :  { %s1151_s11 = smov 0  }
   0x6 LB: > { %s830_s12 = sadd.s32 4294967295, %s1121_s11   ;;  %s831_s13 = sadd.s32 4294967294, %s1121_s11   ;;  %s1121_s11 = sphi %s1151_s11, %s19_s11   ;;  %s1117_s10 = sphi %s1149_s10, %s1324_s10   ;;  %s1113_s9 = sphi %s1147_s9, %s1323_s9  }
   0x7   : > { %s38_s14 = sadd.s32 1, %s1117_s10  ;;  %p834_p0 = scmp.ge.s32.totalorder %s1121_s11, 1 }
   0x8   : > { %p40_p1 = scmp.ge.s32.totalorder %s38_s14, 3  ;;  %p137_p2 = scmp.lt.s32.totalorder %s1121_s11, 4 }
   0x9   : > { %p1169_p3 = scmp.eq.s32.totalorder %s830_s12, 0  ;;  %s1123_s17 = smov [#allocation5]  }
   0xa   : > { %s1326_s14 = smov (%p40_p1, %s38_s14), 0  ;;  %p1175_p4 = pnand %p834_p0, %p137_p2 }
   0xb   : > { %s1314_s15 = scalar_select %p1169_p3, 1, 0 }
   0xc   : > { %s1315_s16 = scalar_select %p1175_p4, 1, 0 }
   0xd   : > { %s153_s18 = sshll.u32 %s1123_s17, 4  ;;  %p944_p5 = pneg %p1175_p4  ;;  %s154_s18 = int_to_ptr.vmem [resolvable:$true] %s153_s18 }
   0xe   : > { %s1005_s22 = scalar_lea.hbm %s1308_s0, 1024 }
   0xf   : > { %p1183_p6 = pnand %p1169_p3, %p944_p5  ;;  %p1006_p9 = scmp.ne.s32.totalorder %s1308_s0, %s1005_s22 }
  0x10   : > { %p1012_p13 = scmp.lt.u32.totalorder %s1005_s22, %s1308_s0 }
  0x11   : > { %p1007_p10 = pneg %p1183_p6 }
  0x13   : > { %p1008_p11 = pnand %p1007_p10, %p1006_p9 }
  0x15   : > { %p1009_p12 = pneg %p1008_p11 }
  0x17   : > { %p1014_p0 = pnand %p1012_p13, %p1009_p12 }
  0x19   : > { %1017 = shalt.err (!%p1014_p0)
}
  0x1a   : > { %s1018_s27 = scalar_lea.vmem %s154_s18, 1024  ;;  %p1026_p8 = scmp.lt.s32.totalorder %s154_s18, %s154_s18 }
  0x1b   : > { %p1019_p1 = scmp.ne.s32.totalorder %s154_s18, %s1018_s27  ;;  %p1027_p7 = scmp.lt.s32.totalorder %s1018_s27, %s1018_s27 }
  0x1d   : > { %p1021_p2 = pnand %p1019_p1, %p1007_p10  ;;  %p1028_p3 = por %p1027_p7, %p1026_p8 }
  0x1f   : > { %p1022_p5 = pneg %p1021_p2 }
  0x21   : > { %p1029_p4 = pnand %p1028_p3, %p1022_p5 }
  0x23   : > { %1032 = shalt.err (!%p1029_p4)
}
  0x24   : > { %s1124_s28 = smov 64   ;;  %s1125_s29 = smov 4  }
  0x25   : > { %947 = dma.hbm_to_vmem [thread:$0]  (!%p1183_p6), %s1308_s0, 1024, %s154_s18, [#allocation6], %s1124_s28, %s1124_s28, %s1125_s29  }
  0x26   : > { %s1126_s4 = smov [#allocation8]   ;;  %p1317_p9 = scmp.lt.s32.totalorder %s1121_s11, 3 }
  0x27   : > { %s183_s5 = sshll.u32 %s1126_s4, 4  ;;  %p1318_p10 = scmp.eq.s32.totalorder %s1121_s11, 0  ;;  %s184_s5 = int_to_ptr.vmem [resolvable:$true] %s183_s5 }
  0x28   : > { %s1033_s17 = scalar_lea.hbm %s1309_s1, 2048 }
  0x29   : > { %p1209_p11 = pnand %p1318_p10, %p1317_p9  ;;  %p1034_p3 = scmp.ne.s32.totalorder %s1309_s1, %s1033_s17 }
  0x2a   : > { %p1040_p8 = scmp.lt.u32.totalorder %s1033_s17, %s1309_s1 }
  0x2b   : > { %p1035_p4 = pneg %p1209_p11 }
  0x2d   : > { %p1036_p6 = pnand %p1035_p4, %p1034_p3 }
  0x2f   : > { %p1037_p7 = pneg %p1036_p6 }
  0x31   : > { %p1042_p12 = pnand %p1040_p8, %p1037_p7 }
  0x33   : > { %1045 = shalt.err (!%p1042_p12)
}
  0x34   : > { %s1046_s22 = scalar_lea.vmem %s184_s5, 2048  ;;  %s1053_s23 = scalar_lea.vmem %s184_s5, 4096 }
  0x35   : > { %p1047_p13 = scmp.ne.s32.totalorder %s184_s5, %s1046_s22  ;;  %p1054_p2 = scmp.lt.s32.totalorder %s184_s5, %s184_s5 }
  0x36   : > { %p1055_p5 = scmp.lt.s32.totalorder %s1053_s23, %s1046_s22 }
  0x37   : > { %p1049_p0 = pnand %p1047_p13, %p1035_p4 }
  0x38   : > { %p1056_p9 = por %p1055_p5, %p1054_p2 }
  0x39   : > { %p1050_p1 = pneg %p1049_p0 }
  0x3b   : > { %p1057_p10 = pnand %p1056_p9, %p1050_p1 }
  0x3d   : > { %1060 = shalt.err (!%p1057_p10)
}
  0x3e   : > { %s1127_s24 = smov 128   ;;  %s1128_s25 = smov 8  }
  0x3f   : > { %951 = dma.hbm_to_vmem [thread:$0]  (!%p1209_p11), %s1309_s1, 2048, %s184_s5, [#allocation9], %s1127_s24, %s1127_s24, %s1128_s25  }
  0x40   : > { %p1320_p3 = scmp.ne.s32.totalorder %s1315_s16, 0 }
  0x41   : > { %p1321_p4 = scmp.ne.s32.totalorder (!%p1320_p3), %s1314_s15, 0 }
  0x42   : > { %195 = sbr.rel (%p1320_p3) target bundleno = 392 (0x188), region = 28 }
  0x49   : > { %1100 = dma.done.wait (%p1321_p4), [#allocation6], 1024  }
  0x4a   : > { %1102 = vsyncadd (%p1321_p4), [#allocation6], 4294966272 }
  0x4b   : > { %1104 = dma.done.wait (%p1321_p4), [#allocation9], 2048  }
  0x4c   : > { %1106 = vsyncadd (%p1321_p4), [#allocation9], 4294965248  ;;  %p239_p11 = scmp.lt.s32.totalorder %s1113_s9, 0  ;;  %s240_s28 = ssub.s32 0, %s1113_s9 }
  0x4d   : > { %s842_s16 = smin.u32 %s1113_s9, %s240_s28  ;;  %p252_p6 = scmp.eq.s32.totalorder %s1113_s9, 0 }
  0x4e   : > { %s242_s29 = sand.u32 1, %s842_s16   ;;  %v258_v0 = vld [vmem:[#allocation8] sm:$0xff] (%p252_p6)  ;;  %v259_v1 = vld [vmem:[#allocation8 + $0x8] sm:$0xff] (%p252_p6)  ;;  %v260_v2 = vld [vmem:[#allocation8 + $0x10] sm:$0xff] (%p252_p6) }
  0x4f   : > { %s243_s30 = ssub.s32 0, %s242_s29  ;;  %257 = sbr.rel (!%p252_p6) target bundleno = 91 (0x5b), region = 40  ;;  %v274_v3 = vpack.c.bf16 (%p252_p6), %v259_v1, %v258_v0  ;;  %295 = vst [vmem:[#allocation3] sm:$0xff] (%p252_p6), %v258_v0  ;;  %296 = vst [vmem:[#allocation3 + $0x8] sm:$0xff] (%p252_p6), %v259_v1  ;;  %v261_v4 = vld [vmem:[#allocation8 + $0x18] sm:$0xff] (%p252_p6)  ;;  %v262_v5 = vld [vmem:[#allocation8 + $0x20] sm:$0xff] (%p252_p6) }
  0x50   : > { %s1328_s30 = smov (!%p239_p11, %s243_s30), %s242_s29  ;;  %297 = vst [vmem:[#allocation3 + $0x10] sm:$0xff] (%p252_p6), %v260_v2  ;;  %v263_v6 = vld [vmem:[#allocation8 + $0x28] sm:$0xff] (%p252_p6)  ;;  %v275_v7 = vpack.c.bf16 (%p252_p6), %v261_v4, %v260_v2  ;;  %298 = vst [vmem:[#allocation3 + $0x18] sm:$0xff] (%p252_p6), %v261_v4  ;;  %v264_v9 = vld [vmem:[#allocation8 + $0x30] sm:$0xff] (%p252_p6) }
  0x51   : > { %p844_p7 = scmp.lt.s32.totalorder %s1328_s30, 0  ;;  %s249_s3 = sadd.s32 2, %s1328_s30  ;;  %v276_v8 = vpack.c.bf16 (%p252_p6), %v263_v6, %v262_v5  ;;  %299 = vst [vmem:[#allocation3 + $0x20] sm:$0xff] (%p252_p6), %v262_v5  ;;  %300 = vst [vmem:[#allocation3 + $0x28] sm:$0xff] (%p252_p6), %v263_v6  ;;  %v265_v10 = vld [vmem:[#allocation8 + $0x38] sm:$0xff] (%p252_p6)  ;;  %v266_v11 = vld [vmem:[#allocation8 + $0x40] sm:$0xff] (%p252_p6) }
  0x52   : > { %286 = vst [vmem:[#allocation2] sm:$0xff] (%p252_p6), %v274_v3  ;;  %v277_v12 = vpack.c.bf16 (%p252_p6), %v265_v10, %v264_v9  ;;  %301 = vst [vmem:[#allocation3 + $0x30] sm:$0xff] (%p252_p6), %v264_v9  ;;  %v267_v13 = vld [vmem:[#allocation8 + $0x48] sm:$0xff] (%p252_p6)  ;;  %v268_v14 = vld [vmem:[#allocation8 + $0x50] sm:$0xff] (%p252_p6) }
  0x53   : > { %s1330_s3 = smov (!%p844_p7, %s249_s3), %s1328_s30  ;;  %302 = vst [vmem:[#allocation3 + $0x38] sm:$0xff] (%p252_p6), %v265_v10  ;;  %303 = vst [vmem:[#allocation3 + $0x40] sm:$0xff] (%p252_p6), %v266_v11  ;;  %v269_v15 = vld [vmem:[#allocation8 + $0x58] sm:$0xff] (%p252_p6)  ;;  %v278_v16 = vpack.c.bf16 (%p252_p6), %v267_v13, %v266_v11  ;;  %v270_v18 = vld [vmem:[#allocation8 + $0x60] sm:$0xff] (%p252_p6) }
  0x54   : > { %s251_s4 = ssub.s32 1, %s1330_s3  ;;  %287 = vst [vmem:[#allocation2 + $0x8] sm:$0xff] (%p252_p6), %v275_v7  ;;  %288 = vst [vmem:[#allocation2 + $0x10] sm:$0xff] (%p252_p6), %v276_v8  ;;  %v279_v17 = vpack.c.bf16 (%p252_p6), %v269_v15, %v268_v14  ;;  %v271_v19 = vld [vmem:[#allocation8 + $0x68] sm:$0xff] (%p252_p6)  ;;  %v272_v20 = vld [vmem:[#allocation8 + $0x70] sm:$0xff] (%p252_p6) }
  0x55   : > { %304 = vst [vmem:[#allocation3 + $0x48] sm:$0xff] (%p252_p6), %v267_v13  ;;  %305 = vst [vmem:[#allocation3 + $0x50] sm:$0xff] (%p252_p6), %v268_v14  ;;  %v280_v21 = vpack.c.bf16 (%p252_p6), %v271_v19, %v270_v18  ;;  %v273_v22 = vld [vmem:[#allocation8 + $0x78] sm:$0xff] (%p252_p6) }
  0x56   : > { %306 = vst [vmem:[#allocation3 + $0x58] sm:$0xff] %v269_v15  ;;  %289 = vst [vmem:[#allocation2 + $0x18] sm:$0xff] %v277_v12  ;;  %v281_v23 = vpack.c.bf16 %v273_v22, %v272_v20 }
  0x57   : > { %307 = vst [vmem:[#allocation3 + $0x60] sm:$0xff] %v270_v18  ;;  %308 = vst [vmem:[#allocation3 + $0x68] sm:$0xff] %v271_v19 }
  0x58   : > { %309 = vst [vmem:[#allocation3 + $0x70] sm:$0xff] %v272_v20  ;;  %290 = vst [vmem:[#allocation2 + $0x20] sm:$0xff] %v278_v16 }
  0x59   : > { %291 = vst [vmem:[#allocation2 + $0x28] sm:$0xff] %v279_v17  ;;  %310 = vst [vmem:[#allocation3 + $0x78] sm:$0xff] %v273_v22 }
  0x5a   : > { %292 = vst [vmem:[#allocation2 + $0x30] sm:$0xff] %v280_v21  ;;  %293 = vst [vmem:[#allocation2 + $0x38] sm:$0xff] %v281_v23 }
  0x5b PF: > { %s846_s15 = sshll.u32 %s1330_s3, 7  ;;  %v997_v24 = vld [vmem:[#allocation5] sm:$0xff]   ;;  %v999_v34 = vld [vmem:[#allocation5 + $0x8] sm:$0xff]   ;;  %v1001_v36 = vld [vmem:[#allocation5 + $0x10] sm:$0xff]   ;;  %p648_p8 = scmp.eq.s32.totalorder %s1113_s9, 2 }
  0x5c   : > { %s329_s5 = sshra.s32 %s846_s15, 4  ;;  %v998_v25 = vld [vmem:[#allocation5 + $0x20] sm:$0xff]   ;;  %900 = vmatprep.mubr.bf16.mxu0 %v997_v24  ;;  %v1000_v35 = vld [vmem:[#allocation5 + $0x28] sm:$0xff]   ;;  %v1002_v37 = vld [vmem:[#allocation5 + $0x30] sm:$0xff]   ;;  %s856_s8 = sshll.u32 %s251_s4, 7 }
  0x5d   : > { %s847_s6 = sshll.u32 %s329_s5, 3  ;;  %908 = vmatprep.mubr.bf16.mxu1 %v998_v25  ;;  %v1003_v38 = vld [vmem:[#allocation5 + $0x18] sm:$0xff]   ;;  %s587_s17 = sshra.s32 %s856_s8, 4  ;;  %v602_v40 = vld [vmem:[#allocation3 + $0x10] sm:$0xff]  ;;  %v600_v42 = vld [vmem:[#allocation3] sm:$0xff] }
  0x5e   : > { %s1247_s7 = scalar_lea.vmem [#allocation2], %s847_s6  ;;  %v1004_v39 = vld [vmem:[#allocation5 + $0x38] sm:$0xff]   ;;  %s857_s20 = sshll.u32 %s587_s17, 3  ;;  %v601_v52 = vld [vmem:[#allocation3 + $0x8] sm:$0xff]  ;;  %v606_v4 = vld [vmem:[#allocation3 + $0x30] sm:$0xff] }
  0x5f   : > { %v608_v43 = vld [vmem:[#allocation3 + $0x40] sm:$0xff]  ;;  %v603_v46 = vld [vmem:[#allocation3 + $0x18] sm:$0xff]  ;;  %s1260_s19 = scalar_lea.vmem [#allocation2], %s857_s20  ;;  %v614_v5 = vld [vmem:[#allocation3 + $0x70] sm:$0xff] }
  0x60   : > { %v604_v6 = vld [vmem:[#allocation3 + $0x20] sm:$0xff]  ;;  %v607_v10 = vld [vmem:[#allocation3 + $0x38] sm:$0xff]  ;;  %v605_v16 = vld [vmem:[#allocation3 + $0x28] sm:$0xff] }
  0x61   : > { %v333_v26 = vld [vmem:[%s1247_s7] sm:$0xff]  ;;  %v334_v27 = vld [vmem:[%s1247_s7 + $0x8] sm:$0xff]  ;;  %v335_v28 = vld [vmem:[%s1247_s7 + $0x10] sm:$0xff] }
  0x62   : > { %884 = vmatprep.subr.bf16.mxu0 %v333_v26  ;;  %916 = vmatprep.subr.bf16.mxu1 %v333_v26  ;;  %v336_v29 = vld [vmem:[%s1247_s7 + $0x18] sm:$0xff]  ;;  %v337_v30 = vld [vmem:[%s1247_s7 + $0x20] sm:$0xff]  ;;  %v338_v31 = vld [vmem:[%s1247_s7 + $0x28] sm:$0xff] }
  0x63   : > { %885 = vmatpush3.bf16.msra.mxu0 %v333_v26  ;;  %924 = vmatpush3.bf16.msra.mxu1 %v333_v26  ;;  %v339_v32 = vld [vmem:[%s1247_s7 + $0x30] sm:$0xff]  ;;  %v340_v33 = vld [vmem:[%s1247_s7 + $0x38] sm:$0xff]  ;;  %v609_v53 = vld [vmem:[#allocation3 + $0x48] sm:$0xff] }
  0x64   : > { %886 = vmatprep.subr.bf16.mxu0 %v334_v27  ;;  %917 = vmatprep.subr.bf16.mxu1 %v334_v27  ;;  %v610_v41 = vld [vmem:[#allocation3 + $0x50] sm:$0xff]  ;;  %v611_v47 = vld [vmem:[#allocation3 + $0x58] sm:$0xff]  ;;  %v612_v7 = vld [vmem:[#allocation3 + $0x60] sm:$0xff] }
  0x65   : > { %v615_v11 = vld [vmem:[#allocation3 + $0x78] sm:$0xff]  ;;  %v613_v17 = vld [vmem:[#allocation3 + $0x68] sm:$0xff] }
  0x67   : > { %887 = vmatpush3.bf16.msra.mxu0 %v334_v27  ;;  %925 = vmatpush3.bf16.msra.mxu1 %v334_v27 }
  0x68   : > { %888 = vmatprep.subr.bf16.mxu0 %v335_v28  ;;  %918 = vmatprep.subr.bf16.mxu1 %v335_v28 }
  0x6b   : > { %889 = vmatpush3.bf16.msra.mxu0 %v335_v28  ;;  %926 = vmatpush3.bf16.msra.mxu1 %v335_v28 }
  0x6c   : > { %890 = vmatprep.subr.bf16.mxu0 %v336_v29  ;;  %919 = vmatprep.subr.bf16.mxu1 %v336_v29 }
  0x6f   : > { %891 = vmatpush3.bf16.msra.mxu0 %v336_v29  ;;  %927 = vmatpush3.bf16.msra.mxu1 %v336_v29 }
  0x70   : > { %892 = vmatprep.subr.bf16.mxu0 %v337_v30  ;;  %920 = vmatprep.subr.bf16.mxu1 %v337_v30 }
  0x73   : > { %893 = vmatpush3.bf16.msra.mxu0 %v337_v30  ;;  %928 = vmatpush3.bf16.msra.mxu1 %v337_v30 }
  0x74   : > { %894 = vmatprep.subr.bf16.mxu0 %v338_v31  ;;  %921 = vmatprep.subr.bf16.mxu1 %v338_v31 }
  0x77   : > { %895 = vmatpush3.bf16.msra.mxu0 %v338_v31  ;;  %929 = vmatpush3.bf16.msra.mxu1 %v338_v31 }
  0x78   : > { %896 = vmatprep.subr.bf16.mxu0 %v339_v32  ;;  %922 = vmatprep.subr.bf16.mxu1 %v339_v32 }
  0x7b   : > { %897 = vmatpush3.bf16.msra.mxu0 %v339_v32  ;;  %930 = vmatpush3.bf16.msra.mxu1 %v339_v32 }
  0x7c   : > { %898 = vmatprep.subr.bf16.mxu0 %v340_v33  ;;  %923 = vmatprep.subr.bf16.mxu1 %v340_v33 }
  0x7f   : > { %899 = vmatpush3.bf16.msra.mxu0 %v340_v33  ;;  %931 = vmatpush3.bf16.msra.mxu1 %v340_v33 }
  0x82   : > { %901 = vmatmul.mubr.bf16.vlgmr.msra.gmra.mrb[0].mxu0 %v999_v34  ;;  %909 = vmatmul.mubr.bf16.vlgmr.msra.gmra.mrb[0].mxu1 %v1000_v35 }
  0x83   : > { %904 = vmatprep.mubr.bf16.mxu0 %v1001_v36  ;;  %912 = vmatprep.mubr.bf16.mxu1 %v1002_v37 }
  0x8a   : > { %905 = vmatmul.mubr.bf16.gmra.mrb[4].mxu0 %v1003_v38  ;;  %913 = vmatmul.mubr.bf16.gmra.mrb[4].mxu1 %v1004_v39 }
 0x155   : > { %v902_v44 = vpop.f32.mrb[0].mxu0  ;;  %v910_v45 = vpop.f32.mrb[0].mxu1 }
 0x156   : > { %v618_v48 = vadd.f32 %v902_v44, %v602_v40  ;;  %v626_v49 = vadd.f32 %v910_v45, %v610_v41  ;;  %v423_v50 = vpop.f32.mrb[1].mxu0  ;;  %v455_v51 = vpop.f32.mrb[1].mxu1 }
 0x157   : > { %v616_v54 = vadd.f32 %v600_v42, %v423_v50  ;;  %v624_v55 = vadd.f32 %v608_v43, %v455_v51  ;;  %v903_v56 = vpop.f32.mrb[2].mxu0  ;;  %v911_v57 = vpop.f32.mrb[2].mxu1 }
 0x158   : > { %634 = vst [vmem:[#allocation3 + $0x10] sm:$0xff] %v618_v48  ;;  %642 = vst [vmem:[#allocation3 + $0x50] sm:$0xff] %v626_v49  ;;  %v580_v58 = vpack.c.bf16 %v903_v56, %v902_v44  ;;  %v619_v59 = vadd.f32 %v903_v56, %v603_v46  ;;  %v584_v60 = vpack.c.bf16 %v911_v57, %v910_v45  ;;  %v426_v62 = vpop.f32.mrb[3].mxu0  ;;  %v458_v63 = vpop.f32.mrb[3].mxu1 }
 0x159   : > { %v627_v61 = vadd.f32 %v911_v57, %v611_v47  ;;  %632 = vst [vmem:[#allocation3] sm:$0xff] %v616_v54  ;;  %640 = vst [vmem:[#allocation3 + $0x40] sm:$0xff] %v624_v55  ;;  %v579_v0 = vpack.c.bf16 %v426_v62, %v423_v50  ;;  %v617_v1 = vadd.f32 %v601_v52, %v426_v62 }
 0x15a   : > { %v583_v2 = vpack.c.bf16 %v458_v63, %v455_v51  ;;  %v625_v3 = vadd.f32 %v609_v53, %v458_v63  ;;  %592 = vst [vmem:[%s1260_s19 + $0x8] sm:$0xff] %v580_v58  ;;  %635 = vst [vmem:[#allocation3 + $0x18] sm:$0xff] %v619_v59 }
 0x15b   : > { %596 = vst [vmem:[%s1260_s19 + $0x28] sm:$0xff] %v584_v60  ;;  %643 = vst [vmem:[#allocation3 + $0x58] sm:$0xff] %v627_v61 }
 0x15c   : > { %591 = vst [vmem:[%s1260_s19] sm:$0xff] %v579_v0  ;;  %633 = vst [vmem:[#allocation3 + $0x8] sm:$0xff] %v617_v1 }
 0x15d   : > { %595 = vst [vmem:[%s1260_s19 + $0x20] sm:$0xff] %v583_v2  ;;  %641 = vst [vmem:[#allocation3 + $0x48] sm:$0xff] %v625_v3  ;;  %v906_v8 = vpop.f32.mrb[4].mxu0  ;;  %v914_v9 = vpop.f32.mrb[4].mxu1 }
 0x15e   : > { %v622_v12 = vadd.f32 %v906_v8, %v606_v4  ;;  %v630_v13 = vadd.f32 %v914_v9, %v614_v5  ;;  %v439_v14 = vpop.f32.mrb[5].mxu0  ;;  %v471_v15 = vpop.f32.mrb[5].mxu1 }
 0x15f   : > { %v620_v18 = vadd.f32 %v604_v6, %v439_v14  ;;  %v628_v19 = vadd.f32 %v612_v7, %v471_v15  ;;  %v907_v20 = vpop.f32.mrb[6].mxu0  ;;  %v915_v21 = vpop.f32.mrb[6].mxu1  ;;  %652 = sbr.rel (!%p648_p8) target bundleno = 368 (0x170), region = 56  ;;  %v656_v34 = vld [vmem:[#allocation3 + $0x10] sm:$0xff] (%p648_p8) }
 0x160   : > { %638 = vst [vmem:[#allocation3 + $0x30] sm:$0xff] %v622_v12  ;;  %646 = vst [vmem:[#allocation3 + $0x70] sm:$0xff] %v630_v13  ;;  %v582_v22 = vpack.c.bf16 %v907_v20, %v906_v8  ;;  %v623_v23 = vadd.f32 %v907_v20, %v607_v10  ;;  %v586_v24 = vpack.c.bf16 %v915_v21, %v914_v9  ;;  %v442_v26 = vpop.f32.mrb[7].mxu0  ;;  %v474_v27 = vpop.f32.mrb[7].mxu1  ;;  %v654_v32 = vld [vmem:[#allocation3] sm:$0xff] (%p648_p8)  ;;  %v672_v37 = vmul.f32 (%p648_p8), 0.25, %v656_v34 }
 0x161   : > { %v631_v25 = vadd.f32 %v915_v21, %v615_v11  ;;  %636 = vst [vmem:[#allocation3 + $0x20] sm:$0xff] %v620_v18  ;;  %644 = vst [vmem:[#allocation3 + $0x60] sm:$0xff] %v628_v19  ;;  %v581_v28 = vpack.c.bf16 %v442_v26, %v439_v14  ;;  %v621_v29 = vadd.f32 %v605_v16, %v442_v26  ;;  %v670_v35 = vmul.f32 (%p648_p8), 0.25, %v654_v32  ;;  %v657_v38 = vld [vmem:[#allocation3 + $0x18] sm:$0xff] (%p648_p8)  ;;  %v662_v46 = vld [vmem:[#allocation3 + $0x40] sm:$0xff] (%p648_p8) }
 0x162   : > { %v585_v30 = vpack.c.bf16 %v474_v27, %v471_v15  ;;  %v629_v31 = vadd.f32 %v613_v17, %v474_v27  ;;  %594 = vst [vmem:[%s1260_s19 + $0x18] sm:$0xff] %v582_v22  ;;  %639 = vst [vmem:[#allocation3 + $0x38] sm:$0xff] %v623_v23  ;;  %v673_v41 = vmul.f32 (%p648_p8), 0.25, %v657_v38  ;;  %v678_v49 = vmul.f32 (%p648_p8), 0.25, %v662_v46  ;;  %v664_v51 = vld [vmem:[#allocation3 + $0x50] sm:$0xff] (%p648_p8)  ;;  %v665_v52 = vld [vmem:[#allocation3 + $0x58] sm:$0xff] (%p648_p8) }
 0x163   : > { %598 = vst [vmem:[%s1260_s19 + $0x38] sm:$0xff] %v586_v24  ;;  %647 = vst [vmem:[#allocation3 + $0x78] sm:$0xff] %v631_v25  ;;  %v655_v33 = vld [vmem:[#allocation3 + $0x8] sm:$0xff] (%p648_p8)  ;;  %v680_v54 = vmul.f32 (%p648_p8), 0.25, %v664_v51  ;;  %v681_v55 = vmul.f32 (%p648_p8), 0.25, %v665_v52 }
 0x164   : > { %593 = vst [vmem:[%s1260_s19 + $0x10] sm:$0xff] %v581_v28  ;;  %637 = vst [vmem:[#allocation3 + $0x28] sm:$0xff] %v621_v29  ;;  %v671_v36 = vmul.f32 (%p648_p8), 0.25, %v655_v33  ;;  %v663_v50 = vld [vmem:[#allocation3 + $0x48] sm:$0xff] (%p648_p8) }
 0x165   : > { %597 = vst [vmem:[%s1260_s19 + $0x30] sm:$0xff] %v585_v30  ;;  %645 = vst [vmem:[#allocation3 + $0x68] sm:$0xff] %v629_v31  ;;  %v679_v53 = vmul.f32 (%p648_p8), 0.25, %v663_v50 }
 0x166   : > { %686 = vst [vmem:[#allocation10] sm:$0xff] %v670_v35  ;;  %687 = vst [vmem:[#allocation10 + $0x8] sm:$0xff] %v671_v36 }
 0x167   : > { %v660_v44 = vld [vmem:[#allocation3 + $0x30] sm:$0xff]  ;;  %688 = vst [vmem:[#allocation10 + $0x10] sm:$0xff] %v672_v37  ;;  %689 = vst [vmem:[#allocation10 + $0x18] sm:$0xff] %v673_v41 }
 0x168   : > { %v658_v39 = vld [vmem:[#allocation3 + $0x20] sm:$0xff]  ;;  %v676_v47 = vmul.f32 0.25, %v660_v44  ;;  %v668_v58 = vld [vmem:[#allocation3 + $0x70] sm:$0xff]  ;;  %694 = vst [vmem:[#allocation10 + $0x40] sm:$0xff] %v678_v49  ;;  %695 = vst [vmem:[#allocation10 + $0x48] sm:$0xff] %v679_v53 }
 0x169   : > { %v674_v42 = vmul.f32 0.25, %v658_v39  ;;  %v661_v45 = vld [vmem:[#allocation3 + $0x38] sm:$0xff]  ;;  %v666_v56 = vld [vmem:[#allocation3 + $0x60] sm:$0xff]  ;;  %v684_v61 = vmul.f32 0.25, %v668_v58  ;;  %696 = vst [vmem:[#allocation10 + $0x50] sm:$0xff] %v680_v54  ;;  %697 = vst [vmem:[#allocation10 + $0x58] sm:$0xff] %v681_v55 }
 0x16a   : > { %v677_v48 = vmul.f32 0.25, %v661_v45  ;;  %692 = vst [vmem:[#allocation10 + $0x30] sm:$0xff] %v676_v47  ;;  %v682_v59 = vmul.f32 0.25, %v666_v56  ;;  %v669_v62 = vld [vmem:[#allocation3 + $0x78] sm:$0xff] }
 0x16b   : > { %v659_v40 = vld [vmem:[#allocation3 + $0x28] sm:$0xff]  ;;  %690 = vst [vmem:[#allocation10 + $0x20] sm:$0xff] %v674_v42  ;;  %v685_v63 = vmul.f32 0.25, %v669_v62  ;;  %700 = vst [vmem:[#allocation10 + $0x70] sm:$0xff] %v684_v61 }
 0x16c   : > { %v675_v43 = vmul.f32 0.25, %v659_v40  ;;  %v667_v57 = vld [vmem:[#allocation3 + $0x68] sm:$0xff]  ;;  %693 = vst [vmem:[#allocation10 + $0x38] sm:$0xff] %v677_v48  ;;  %698 = vst [vmem:[#allocation10 + $0x60] sm:$0xff] %v682_v59 }
 0x16d   : > { %v683_v60 = vmul.f32 0.25, %v667_v57  ;;  %701 = vst [vmem:[#allocation10 + $0x78] sm:$0xff] %v685_v63 }
 0x16e   : > { %691 = vst [vmem:[#allocation10 + $0x28] sm:$0xff] %v675_v43 }
 0x16f   : > { %699 = vst [vmem:[#allocation10 + $0x68] sm:$0xff] %v683_v60 }
 0x170 PF: > { %p1274_p12 = scmp.eq.s32.totalorder %s830_s12, 2  ;;  %s1129_s18 = smov [#allocation10]  }
 0x171   : > { %s718_s21 = sshll.u32 %s1129_s18, 4  ;;  %s719_s21 = int_to_ptr.vmem [resolvable:$true] %s718_s21 }
 0x172   : > { %s1061_s22 = scalar_lea.vmem %s719_s21, 2048  ;;  %s1067_s23 = scalar_lea.vmem %s719_s21, 4096 }
 0x173   : > { %p1062_p13 = scmp.ne.s32.totalorder %s719_s21, %s1061_s22  ;;  %p1068_p2 = scmp.lt.s32.totalorder %s719_s21, %s719_s21 }
 0x174   : > { %p1069_p5 = scmp.lt.s32.totalorder %s1067_s23, %s1061_s22 }
 0x175   : > { %p1063_p0 = pnand %p1062_p13, %p1274_p12 }
 0x176   : > { %p1070_p9 = por %p1069_p5, %p1068_p2 }
 0x177   : > { %p1064_p1 = pneg %p1063_p0 }
 0x179   : > { %p1071_p10 = pnand %p1070_p9, %p1064_p1 }
 0x17b   : > { %1074 = shalt.err (!%p1071_p10)
}
 0x17c   : > { %s1075_s25 = scalar_lea.hbm %s1310_s2, 2048 }
 0x17d   : > { %p1076_p3 = scmp.ne.s32.totalorder %s1310_s2, %s1075_s25  ;;  %p1081_p6 = scmp.lt.u32.totalorder %s1075_s25, %s1310_s2 }
 0x17f   : > { %p1077_p4 = pnand %p1076_p3, %p1274_p12 }
 0x181   : > { %p1078_p11 = pneg %p1077_p4 }
 0x183   : > { %p1083_p7 = pnand %p1081_p6, %p1078_p11 }
 0x185   : > { %1086 = shalt.err (!%p1083_p7)
}
 0x186   : > { %s1130_s29 = smov 128   ;;  %s1131_s30 = smov 8  }
 0x187   : > { %941 = dma.vmem_to_hbm [thread:$0]  (%p1274_p12), %s719_s21, 2048, %s1310_s2, [#allocation7], %s1130_s29, %s1130_s29, %s1131_s30  }
 0x188 PF: > { %p962_p8 = scmp.ge.s32.totalorder %s1121_s11, 2  ;;  %p963_p13 = scmp.eq.s32.totalorder %s831_s13, 2 }
 0x18a   : > { %p953_p0 = pnand %p963_p13, %p962_p8 }
 0x18c   : > { %1108 = dma.done.wait (!%p953_p0), [#allocation7], 2048  }
 0x18d   : > { %1110 = vsyncadd (!%p953_p0), [#allocation7], 4294965248  ;;  %s19_s11 = sadd.s32 1, %s1121_s11   ;;  %s1323_s9 = smov %s1117_s10 }
 0x18e   : > { %p16_p1 = scmp.ge.s32.totalorder %s19_s11, 5   ;;  %s1324_s10 = smov %s1326_s14 }
 0x190   :  { %18 = sbr.rel (!%p16_p1) target bundleno = 6 (0x6), region = 105 }
 0x197   :  { %739 = vsyncpa [#allocation6], 1 }
 0x198   :  { %741 = vsyncpa [#allocation6 + $0x1], 1 }
 0x199   :  { %742 = vsyncpa [#allocation9], 1 }
 0x19a   :  { %744 = vsyncpa [#allocation9 + $0x1], 1 }
 0x19b   :  { %745 = vsyncpa [#allocation7], 1 }
 0x19c   :  { %747 = vsyncpa [#allocation7 + $0x1], 1 }

</bundles_post_ra>
